<compile_context>
chip_gen: v7x
topology: tpu7x:2x2x1
jax: 0.10.0
libtpu: 0.0.40
codegen_flags: <defaults>
</compile_context>

<pallas_src>
import functools

import jax
import jax.numpy as jnp
from jax.experimental import pallas as pl
from jax.experimental.pallas import tpu as pltpu


def _cdiv(a, b):
    return -(-a // b)


def _round_up(a, b):
    return _cdiv(a, b) * b


def _vmem_budget_bytes():
    """Returns (tile budget, physical VMEM capacity) — generation aware."""
    cap = 64 << 20  # conservative fallback = v7x per-core VMEM
    try:
        info = pltpu.get_tpu_info()
        cap = int(getattr(info, "vmem_capacity_bytes", cap)) or cap
    except Exception:
        pass
    return (cap * 72) // 100, cap


# -----------------------------------------------------------------------------
# Fused path: stats + BN + ReLU + 1x1 conv in a single kernel (one HBM pass).
# -----------------------------------------------------------------------------
def _fused_kernel(x_ref, gamma_ref, beta_ref, w_ref, o_ref, *, eps, n_batch):
    # x_ref: (N, Cin, HW)  gamma/beta: (Cin, 1)  w: (Cout, Cin)  o: (N, Cout, HW)
    cnt = float(n_batch) * float(x_ref.shape[2])

    # pass 1 (VMEM resident -> no extra HBM traffic): per-channel mean
    s1 = jnp.zeros((x_ref.shape[1], 1), jnp.float32)
    for n in range(n_batch):
        s1 = s1 + jnp.sum(x_ref[n].astype(jnp.float32), axis=1, keepdims=True)
    mean = s1 / cnt

    # pass 2: exact centered (biased, train-mode) variance
    s2 = jnp.zeros_like(s1)
    for n in range(n_batch):
        d = x_ref[n].astype(jnp.float32) - mean
        s2 = s2 + jnp.sum(d * d, axis=1, keepdims=True)
    var = s2 / cnt

    scale = gamma_ref[...] * jax.lax.rsqrt(var + eps)   # (Cin, 1)   EUP
    shift = beta_ref[...] - mean * scale                # (Cin, 1)

    w = w_ref[...]                                      # (Cout, Cin), hoisted
    # pass 3: BN + ReLU (VPU) + 1x1 conv (MXU), per batch element
    for n in range(n_batch):
        h = jnp.maximum(x_ref[n].astype(jnp.float32) * scale + shift, 0.0)
        o_ref[n] = jnp.dot(w, h,
                           preferred_element_type=jnp.float32).astype(o_ref.dtype)


# -----------------------------------------------------------------------------
# Tiled path kernels (activations too large for VMEM residency).
# -----------------------------------------------------------------------------
def _bn_stats_kernel(x_ref, pivot_ref, s1_ref, s2_ref, *, hw):
    # Accumulates pivot-shifted per-channel sums over the whole (N, HW) grid.
    # x_ref: (1, Cin, thw)   pivot/s1/s2: (Cin, 1)
    n = pl.program_id(0)
    j = pl.program_id(1)

    @pl.when((n == 0) & (j == 0))
    def _():
        s1_ref[...] = jnp.zeros_like(s1_ref)
        s2_ref[...] = jnp.zeros_like(s2_ref)

    x = x_ref[0].astype(jnp.float32) - pivot_ref[...]
    thw = x.shape[1]
    # Mask lanes past HW: the last block may be partial (no wrapper-side pad).
    lane = jax.lax.broadcasted_iota(jnp.int32, x.shape, 1)
    x = jnp.where(j * thw + lane < hw, x, 0.0)
    s1_ref[...] += jnp.sum(x, axis=1, keepdims=True)
    s2_ref[...] += jnp.sum(x * x, axis=1, keepdims=True)


def _bn_relu_conv1x1_kernel(x_ref, scale_ref, shift_ref, w_ref, o_ref):
    # x_ref: (1, Cin, thw) -> o_ref: (1, Cout, thw).  Lanes past HW in a partial
    # last block produce garbage columns that the masked store drops (columns
    # are independent through the channel matmul).
    h = jnp.maximum(
        x_ref[0].astype(jnp.float32) * scale_ref[...] + shift_ref[...], 0.0)   # VPU
    o_ref[0] = jnp.dot(w_ref[...], h,
                       preferred_element_type=jnp.float32).astype(o_ref.dtype)  # MXU


# -----------------------------------------------------------------------------
# Wrapper
# -----------------------------------------------------------------------------
def conv2d_block_reverse(x_nchw, gamma, beta, weight, eps=1e-5, max_lanes=None):
    """relu(batchnorm(x, train-mode batch stats)) -> 1x1 conv (stride 1, no pad,
    groups=1, no bias).  `max_lanes` forces the tiled path (testing)."""
    N, Cin, H, W = x_nchw.shape
    Cout, Cin_w, kh, kw = weight.shape
    if not (Cin_w == Cin and kh == 1 and kw == 1):
        # TODO(synk): only the module's default 1x1 / stride-1 / pad-0 / g=1 conv.
        raise NotImplementedError("only kernel=(1,1), pad=(0,0), stride=(1,1), g=1")

    HW = H * W
    x3 = x_nchw.reshape(N, Cin, HW)                  # free view: NCHW-native, HW in lanes
    w2 = weight.reshape(Cout, Cin).astype(jnp.float32)
    g2 = gamma.reshape(Cin, 1).astype(jnp.float32)
    b2 = beta.reshape(Cin, 1).astype(jnp.float32)

    bpe = 4  # f32
    budget, vmem_cap = _vmem_budget_bytes()
    cin8, cout8 = _round_up(Cin, 8), _round_up(Cout, 8)
    hw128 = _round_up(HW, 128)
    w_bytes = 2 * cout8 * _round_up(Cin, 128) * bpe            # dbl-buffered weight
    vec_bytes = 4 * cin8 * 128 * bpe                           # scale/shift, dbl-buffered
    conv_flops = 2 * N * Cout * Cin * HW

    # ---------------- fused single-HBM-pass path ----------------
    fused_bytes = N * (cin8 + cout8) * hw128 * bpe + w_bytes + vec_bytes
    if max_lanes is None and 3 * fused_bytes <= budget:
        vmem_limit = int(min(vmem_cap * 85 // 100, max(3 * fused_bytes, 32 << 20)))
        out3 = pl.pallas_call(
            functools.partial(_fused_kernel, eps=float(eps), n_batch=N),
            out_shape=jax.ShapeDtypeStruct((N, Cout, HW), x_nchw.dtype),
            grid_spec=pltpu.PrefetchScalarGridSpec(
                num_scalar_prefetch=0,
                grid=(1,),
                in_specs=[
                    pl.BlockSpec((N, Cin, HW), lambda i: (0, 0, 0)),
                    pl.BlockSpec((Cin, 1), lambda i: (0, 0)),
                    pl.BlockSpec((Cin, 1), lambda i: (0, 0)),
                    pl.BlockSpec((Cout, Cin), lambda i: (0, 0)),
                ],
                out_specs=pl.BlockSpec((N, Cout, HW), lambda i: (0, 0, 0)),
            ),
            compiler_params=pltpu.CompilerParams(
                dimension_semantics=("arbitrary",),
                vmem_limit_bytes=vmem_limit,
            ),
            cost_estimate=pl.CostEstimate(
                flops=int(conv_flops + 7 * N * Cin * HW),
                transcendentals=int(Cin),
                bytes_accessed=int((N * Cin * HW + N * Cout * HW) * bpe),
            ),
        )(x3, g2, b2, w2)
        # TODO(synk): fused path runs on a single TensorCore; large inputs take
        # the megacore-parallel tiled path below instead.
        return out3.reshape(N, Cout, H, W)

    # ---------------- tiled path ----------------
    per_lane = 2 * (cin8 + cout8) * bpe                        # dbl-buffered x/out tiles
    lanes_avail = (budget - w_bytes - vec_bytes) // per_lane
    if lanes_avail < 128:
        # TODO(synk): Cout/K-tiled weight path for very large Cin*Cout.
        raise NotImplementedError("weight too large for resident-weight kernel")

    thw = max(128, min((lanes_avail // 128) * 128, 32768, hw128))
    if max_lanes is not None:
        thw = min(thw, max(128, (int(max_lanes) // 128) * 128))
    if N == 1 and HW >= 256:
        thw = min(thw, _round_up(_cdiv(HW, 2), 128))   # v7x: feed both TensorCores
    if thw >= HW:
        thw = HW                                       # full-dim block: no masking needed
    n_hw = _cdiv(HW, thw)

    vmem_need = per_lane * thw + w_bytes + vec_bytes
    vmem_limit = int(min(vmem_cap * 85 // 100, max(2 * vmem_need, 32 << 20)))

    # One-HBM-pass batch statistics (pivot-shifted to limit f32 cancellation).
    pivot = x3[0, :, 0:1].astype(jnp.float32)          # (Cin, 1) per-channel pivot
    s1, s2 = pl.pallas_call(
        functools.partial(_bn_stats_kernel, hw=HW),
        out_shape=(jax.ShapeDtypeStruct((Cin, 1), jnp.float32),
                   jax.ShapeDtypeStruct((Cin, 1), jnp.float32)),
        grid_spec=pltpu.PrefetchScalarGridSpec(
            num_scalar_prefetch=0,
            grid=(N, n_hw),
            in_specs=[
                pl.BlockSpec((1, Cin, thw), lambda n, j: (n, 0, j)),
                pl.BlockSpec((Cin, 1), lambda n, j: (0, 0)),
            ],
            out_specs=(pl.BlockSpec((Cin, 1), lambda n, j: (0, 0)),
                       pl.BlockSpec((Cin, 1), lambda n, j: (0, 0))),
        ),
        compiler_params=pltpu.CompilerParams(
            dimension_semantics=("arbitrary", "arbitrary"),
            vmem_limit_bytes=vmem_limit,
        ),
        cost_estimate=pl.CostEstimate(
            flops=int(4 * N * Cin * HW),
            transcendentals=0,
            bytes_accessed=int(N * Cin * HW * bpe),
        ),
    )(x3, pivot)

    cnt = jnp.float32(N * HW)
    m1 = s1 / cnt                                      # E[x - pivot]
    var = jnp.maximum(s2 / cnt - m1 * m1, 0.0)         # biased (train-mode) variance
    mean = pivot + m1
    scale = g2 * jax.lax.rsqrt(var + eps)
    shift = b2 - mean * scale

    out3 = pl.pallas_call(
        _bn_relu_conv1x1_kernel,
        out_shape=jax.ShapeDtypeStruct((N, Cout, HW), x_nchw.dtype),
        grid_spec=pltpu.PrefetchScalarGridSpec(
            num_scalar_prefetch=0,
            grid=(N, n_hw),
            in_specs=[
                pl.BlockSpec((1, Cin, thw), lambda n, j: (n, 0, j)),
                pl.BlockSpec((Cin, 1), lambda n, j: (0, 0)),
                pl.BlockSpec((Cin, 1), lambda n, j: (0, 0)),
                pl.BlockSpec((Cout, Cin), lambda n, j: (0, 0)),
            ],
            out_specs=pl.BlockSpec((1, Cout, thw), lambda n, j: (n, 0, j)),
        ),
        compiler_params=pltpu.CompilerParams(
            dimension_semantics=("parallel", "parallel"),
            vmem_limit_bytes=vmem_limit,
        ),
        cost_estimate=pl.CostEstimate(
            flops=int(conv_flops + 3 * N * Cin * HW),
            transcendentals=0,
            bytes_accessed=int((N * Cin * HW + N * Cout * HW) * bpe),
        ),
    )(x3, scale, shift, w2)

    return out3.reshape(N, Cout, H, W)


def _reference(x_nchw, gamma, beta, weight, eps=1e-5):
    mean = jnp.mean(x_nchw, axis=(0, 2, 3), keepdims=True)
    var = jnp.mean((x_nchw - mean) ** 2, axis=(0, 2, 3), keepdims=True)
    h = (x_nchw - mean) / jnp.sqrt(var + eps)
    h = h * gamma[None, :, None, None] + beta[None, :, None, None]
    h = jnp.maximum(h, 0.0)
    return jnp.einsum("nchw,oc->nohw", h, weight.reshape(weight.shape[0], -1))


if __name__ == "__main__":
    key = jax.random.PRNGKey(0)
    k_x, k_g, k_b, k_w = jax.random.split(key, 4)

    N, Cin, H, W, Cout = 2, 4, 16, 16, 8
    x = jax.random.normal(k_x, (N, Cin, H, W), dtype=jnp.float32)
    gamma = 1.0 + 0.1 * jax.random.normal(k_g, (Cin,), dtype=jnp.float32)
    beta = 0.1 * jax.random.normal(k_b, (Cin,), dtype=jnp.float32)
    weight = 0.5 * jax.random.normal(k_w, (Cout, Cin, 1, 1), dtype=jnp.float32)

    ref = _reference(x, gamma, beta, weight)

    # 1) Fused single-pass path (default at these sizes).
    out_fused = jax.block_until_ready(conv2d_block_reverse(x, gamma, beta, weight))
    assert out_fused.shape == (N, Cout, H, W)
    assert jnp.allclose(out_fused, ref, atol=1e-4, rtol=1e-4)

    # 2) Tiled path (forced small tile) — exercises stats kernel + conv kernel.
    out_tiled = jax.block_until_ready(
        conv2d_block_reverse(x, gamma, beta, weight, max_lanes=128))
    assert out_tiled.shape == (N, Cout, H, W)
    assert jnp.allclose(out_tiled, ref, atol=1e-4, rtol=1e-4)

    print("KERNEL_OK")
</pallas_src>

<mosaic_0001>
module attributes {stable_mosaic.version = 11 : i64} {
  func.func @_fused_kernel(%arg0: i32, %arg1: memref<2x4x256xf32, #tpu.memory_space<vmem>>, %arg2: memref<4x1xf32, #tpu.memory_space<vmem>>, %arg3: memref<4x1xf32, #tpu.memory_space<vmem>>, %arg4: memref<8x4xf32, #tpu.memory_space<vmem>>, %arg5: memref<2x8x256xf32, #tpu.memory_space<vmem>>) attributes {dimension_semantics = [#tpu.dimension_semantics<arbitrary>], iteration_bounds = array<i64: 1>, scalar_prefetch = 0 : i64, scratch_operands = 0 : i64, tpu.core_type = #tpu.core_type<tc>, window_params = [{pipeline_mode = #tpu.pipeline_mode<synchronous>, transform_indices = @transform_0, window_bounds = array<i64: 2, 4, 256>}, {pipeline_mode = #tpu.pipeline_mode<synchronous>, transform_indices = @transform_1, window_bounds = array<i64: 4, 1>}, {pipeline_mode = #tpu.pipeline_mode<synchronous>, transform_indices = @transform_2, window_bounds = array<i64: 4, 1>}, {pipeline_mode = #tpu.pipeline_mode<synchronous>, transform_indices = @transform_3, window_bounds = array<i64: 8, 4>}, {pipeline_mode = #tpu.pipeline_mode<synchronous>, transform_indices = @transform_4, window_bounds = array<i64: 2, 8, 256>}]} {
    %cst = arith.constant 0.000000e+00 : f32
    %0 = vector.broadcast %cst : f32 to vector<4x1xf32>
    %c0 = arith.constant 0 : index
    %c0_0 = arith.constant 0 : index
    %c0_1 = arith.constant 0 : index
    %1 = vector.load %arg1[%c0, %c0_0, %c0_1] : memref<2x4x256xf32, #tpu.memory_space<vmem>>, vector<1x4x256xf32>
    %2 = vector.shape_cast %1 : vector<1x4x256xf32> to vector<4x256xf32>
    %cst_2 = arith.constant dense<0.000000e+00> : vector<4xf32>
    %3 = vector.multi_reduction <add>, %2, %cst_2 [1] : vector<4x256xf32> to vector<4xf32>
    %4 = vector.shape_cast %3 : vector<4xf32> to vector<4x1xf32>
    %5 = arith.addf %0, %4 : vector<4x1xf32>
    %c1 = arith.constant 1 : index
    %c0_3 = arith.constant 0 : index
    %c0_4 = arith.constant 0 : index
    %6 = vector.load %arg1[%c1, %c0_3, %c0_4] : memref<2x4x256xf32, #tpu.memory_space<vmem>>, vector<1x4x256xf32>
    %7 = vector.shape_cast %6 : vector<1x4x256xf32> to vector<4x256xf32>
    %cst_5 = arith.constant dense<0.000000e+00> : vector<4xf32>
    %8 = vector.multi_reduction <add>, %7, %cst_5 [1] : vector<4x256xf32> to vector<4xf32>
    %9 = vector.shape_cast %8 : vector<4xf32> to vector<4x1xf32>
    %10 = arith.addf %5, %9 : vector<4x1xf32>
    %cst_6 = arith.constant 5.120000e+02 : f32
    %11 = vector.broadcast %cst_6 : f32 to vector<4x1xf32>
    %12 = arith.divf %10, %11 : vector<4x1xf32>
    %cst_7 = arith.constant 0.000000e+00 : f32
    %13 = vector.broadcast %cst_7 : f32 to vector<4x1xf32>
    %c0_8 = arith.constant 0 : index
    %c0_9 = arith.constant 0 : index
    %c0_10 = arith.constant 0 : index
    %14 = vector.load %arg1[%c0_8, %c0_9, %c0_10] : memref<2x4x256xf32, #tpu.memory_space<vmem>>, vector<1x4x256xf32>
    %15 = vector.shape_cast %14 : vector<1x4x256xf32> to vector<4x256xf32>
    %16 = vector.broadcast %12 : vector<4x1xf32> to vector<4x256xf32>
    %17 = arith.subf %15, %16 : vector<4x256xf32>
    %18 = arith.mulf %17, %17 : vector<4x256xf32>
    %cst_11 = arith.constant dense<0.000000e+00> : vector<4xf32>
    %19 = vector.multi_reduction <add>, %18, %cst_11 [1] : vector<4x256xf32> to vector<4xf32>
    %20 = vector.shape_cast %19 : vector<4xf32> to vector<4x1xf32>
    %21 = arith.addf %13, %20 : vector<4x1xf32>
    %c1_12 = arith.constant 1 : index
    %c0_13 = arith.constant 0 : index
    %c0_14 = arith.constant 0 : index
    %22 = vector.load %arg1[%c1_12, %c0_13, %c0_14] : memref<2x4x256xf32, #tpu.memory_space<vmem>>, vector<1x4x256xf32>
    %23 = vector.shape_cast %22 : vector<1x4x256xf32> to vector<4x256xf32>
    %24 = vector.broadcast %12 : vector<4x1xf32> to vector<4x256xf32>
    %25 = arith.subf %23, %24 : vector<4x256xf32>
    %26 = arith.mulf %25, %25 : vector<4x256xf32>
    %cst_15 = arith.constant dense<0.000000e+00> : vector<4xf32>
    %27 = vector.multi_reduction <add>, %26, %cst_15 [1] : vector<4x256xf32> to vector<4xf32>
    %28 = vector.shape_cast %27 : vector<4xf32> to vector<4x1xf32>
    %29 = arith.addf %21, %28 : vector<4x1xf32>
    %cst_16 = arith.constant 5.120000e+02 : f32
    %30 = vector.broadcast %cst_16 : f32 to vector<4x1xf32>
    %31 = arith.divf %29, %30 : vector<4x1xf32>
    %c0_17 = arith.constant 0 : index
    %c0_18 = arith.constant 0 : index
    %32 = vector.load %arg2[%c0_17, %c0_18] : memref<4x1xf32, #tpu.memory_space<vmem>>, vector<4x1xf32>
    %cst_19 = arith.constant 9.99999974E-6 : f32
    %33 = vector.broadcast %cst_19 : f32 to vector<4x1xf32>
    %34 = arith.addf %31, %33 : vector<4x1xf32>
    %35 = math.rsqrt %34 : vector<4x1xf32>
    %36 = arith.mulf %32, %35 : vector<4x1xf32>
    %c0_20 = arith.constant 0 : index
    %c0_21 = arith.constant 0 : index
    %37 = vector.load %arg3[%c0_20, %c0_21] : memref<4x1xf32, #tpu.memory_space<vmem>>, vector<4x1xf32>
    %38 = arith.mulf %12, %36 : vector<4x1xf32>
    %39 = arith.subf %37, %38 : vector<4x1xf32>
    %c0_22 = arith.constant 0 : index
    %c0_23 = arith.constant 0 : index
    %40 = vector.load %arg4[%c0_22, %c0_23] : memref<8x4xf32, #tpu.memory_space<vmem>>, vector<8x4xf32>
    %c0_24 = arith.constant 0 : index
    %c0_25 = arith.constant 0 : index
    %c0_26 = arith.constant 0 : index
    %41 = vector.load %arg1[%c0_24, %c0_25, %c0_26] : memref<2x4x256xf32, #tpu.memory_space<vmem>>, vector<1x4x256xf32>
    %42 = vector.shape_cast %41 : vector<1x4x256xf32> to vector<4x256xf32>
    %43 = vector.broadcast %36 : vector<4x1xf32> to vector<4x256xf32>
    %44 = arith.mulf %42, %43 : vector<4x256xf32>
    %45 = vector.broadcast %39 : vector<4x1xf32> to vector<4x256xf32>
    %46 = arith.addf %44, %45 : vector<4x256xf32>
    %cst_27 = arith.constant 0.000000e+00 : f32
    %47 = vector.broadcast %cst_27 : f32 to vector<4x256xf32>
    %48 = arith.maximumf %46, %47 : vector<4x256xf32>
    %cst_28 = arith.constant dense<0.000000e+00> : vector<8x256xf32>
    %49 = tpu.matmul %40, %48, %cst_28 {dimension_numbers = #tpu.dot_dimension_numbers<[1], [0], [0], [1], [0, 0, 1, 1], [], []>} : vector<8x4xf32>, vector<4x256xf32>, vector<8x256xf32> -> vector<8x256xf32>
    %c0_29 = arith.constant 0 : index
    %c0_30 = arith.constant 0 : index
    %c0_31 = arith.constant 0 : index
    %50 = vector.load %arg5[%c0_29, %c0_30, %c0_31] : memref<2x8x256xf32, #tpu.memory_space<vmem>>, vector<1x8x256xf32>
    %51 = vector.shape_cast %50 : vector<1x8x256xf32> to vector<8x256xf32>
    %52 = vector.shape_cast %49 : vector<8x256xf32> to vector<1x8x256xf32>
    tpu.vector_store %arg5[%c0_29, %c0_30, %c0_31], %52 {strides = array<i32>} : memref<2x8x256xf32, #tpu.memory_space<vmem>>, vector<1x8x256xf32>,
    %c1_32 = arith.constant 1 : index
    %c0_33 = arith.constant 0 : index
    %c0_34 = arith.constant 0 : index
    %53 = vector.load %arg1[%c1_32, %c0_33, %c0_34] : memref<2x4x256xf32, #tpu.memory_space<vmem>>, vector<1x4x256xf32>
    %54 = vector.shape_cast %53 : vector<1x4x256xf32> to vector<4x256xf32>
    %55 = vector.broadcast %36 : vector<4x1xf32> to vector<4x256xf32>
    %56 = arith.mulf %54, %55 : vector<4x256xf32>
    %57 = vector.broadcast %39 : vector<4x1xf32> to vector<4x256xf32>
    %58 = arith.addf %56, %57 : vector<4x256xf32>
    %cst_35 = arith.constant 0.000000e+00 : f32
    %59 = vector.broadcast %cst_35 : f32 to vector<4x256xf32>
    %60 = arith.maximumf %58, %59 : vector<4x256xf32>
    %cst_36 = arith.constant dense<0.000000e+00> : vector<8x256xf32>
    %61 = tpu.matmul %40, %60, %cst_36 {dimension_numbers = #tpu.dot_dimension_numbers<[1], [0], [0], [1], [0, 0, 1, 1], [], []>} : vector<8x4xf32>, vector<4x256xf32>, vector<8x256xf32> -> vector<8x256xf32>
    %c1_37 = arith.constant 1 : index
    %c0_38 = arith.constant 0 : index
    %c0_39 = arith.constant 0 : index
    %62 = vector.load %arg5[%c1_37, %c0_38, %c0_39] : memref<2x8x256xf32, #tpu.memory_space<vmem>>, vector<1x8x256xf32>
    %63 = vector.shape_cast %62 : vector<1x8x256xf32> to vector<8x256xf32>
    %64 = vector.shape_cast %61 : vector<8x256xf32> to vector<1x8x256xf32>
    tpu.vector_store %arg5[%c1_37, %c0_38, %c0_39], %64 {strides = array<i32>} : memref<2x8x256xf32, #tpu.memory_space<vmem>>, vector<1x8x256xf32>,
    return
  }
  func.func @transform_0(%arg0: i32) -> (i32, i32, i32) {
    %c0_i32 = arith.constant 0 : i32
    %c0_i32_0 = arith.constant 0 : i32
    %c0_i32_1 = arith.constant 0 : i32
    %c0_i32_2 = arith.constant 0 : i32
    return %c0_i32, %c0_i32_0, %c0_i32_1 : i32, i32, i32
  }
  func.func @transform_1(%arg0: i32) -> (i32, i32) {
    %c0_i32 = arith.constant 0 : i32
    %c0_i32_0 = arith.constant 0 : i32
    %c0_i32_1 = arith.constant 0 : i32
    return %c0_i32, %c0_i32_0 : i32, i32
  }
  func.func @transform_2(%arg0: i32) -> (i32, i32) {
    %c0_i32 = arith.constant 0 : i32
    %c0_i32_0 = arith.constant 0 : i32
    %c0_i32_1 = arith.constant 0 : i32
    return %c0_i32, %c0_i32_0 : i32, i32
  }
  func.func @transform_3(%arg0: i32) -> (i32, i32) {
    %c0_i32 = arith.constant 0 : i32
    %c0_i32_0 = arith.constant 0 : i32
    %c0_i32_1 = arith.constant 0 : i32
    return %c0_i32, %c0_i32_0 : i32, i32
  }
  func.func @transform_4(%arg0: i32) -> (i32, i32, i32) {
    %c0_i32 = arith.constant 0 : i32
    %c0_i32_0 = arith.constant 0 : i32
    %c0_i32_1 = arith.constant 0 : i32
    %c0_i32_2 = arith.constant 0 : i32
    return %c0_i32, %c0_i32_0, %c0_i32_1 : i32, i32, i32
  }
}

</mosaic_0001>

<bundles_post_ra>
// kernel: tpu_custom_call.1
= control target key start
LH: loop header
LB: loop body
LE: loop exit
PB: predicated region body
PF: predicated region fallthrough
CT: control target
= control target key end

     0   :  { %vm22_vm0 = vcmask 1043456   ;;  %s406_s0 = inlined_call_operand.vmem [shape: f32[2,4,256], index: 0, kind: input, shape index: {}]   ;;  %s407_s1 = inlined_call_operand.vmem [shape: f32[4,1], index: 1, kind: input, shape index: {}]   ;;  %s408_s2 = inlined_call_operand.vmem [shape: f32[4,1], index: 2, kind: input, shape index: {}]   ;;  %s409_s3 = inlined_call_operand.vmem [shape: f32[8,4], index: 3, kind: input, shape index: {}]   ;;  %s410_s4 = inlined_call_operand.hbm [shape: f32[2,8,256], index: 4, kind: output, shape index: {}]  }
   0x1   :  { %v18_v0 = vld [vmem:[%s406_s0] sm:$0xff]  ;;  %v292_v1 = vld [vmem:[%s406_s0 + $0x8] sm:$0xff] }
   0x2   :  { %9 = vsyncpa [#allocation3], 0  ;;  %v20_v2 = vcombine.high %v18_v0, %v18_v0  ;;  %v23_v3 = vsel %vm22_vm0, %v18_v0, 0.0  ;;  %v32_v4 = vcombine.high %v292_v1, %v292_v1  ;;  %v34_v6 = vsel %vm22_vm0, %v292_v1, 0.0  ;;  %v74_v39 = vld [vmem:[%s407_s1] sm:$0xf] }
   0x3   :  { %v336_v10 = vmov 839922192   ;;  %v46_v12 = vlaneseq  ;;  %v337_v33 = vmov 0   ;;  %v78_v42 = vld [vmem:[%s408_s2] sm:$0xf]  ;;  %v338_v45 = vmov 0.0  }
   0x4   :  { %v24_v5 = vsel %vm22_vm0, %v20_v2, 0.0  ;;  %v35_v7 = vsel %vm22_vm0, %v32_v4, 0.0  ;;  %v44_v11 = vunpack.c.l.s4 %v336_v10  ;;  %306 = vset.pattern.permute.xlu0 %v337_v33  ;;  %307 = vset.pattern.permute.xlu1 %v337_v33  ;;  %v81_v58 = vld [vmem:[%s409_s3] sm:$0xff]  ;;  %vm111_vm1 = vcmask 31744   ;;  %s339_s22 = smov [#allocation2]  }
   0x5   :  { %v25_v8 = vadd.f32 %v24_v5, %v23_v3  ;;  %v36_v9 = vadd.f32 %v35_v7, %v34_v6  ;;  %v47_v15 = vshrl.u32 %v46_v12, 7  ;;  %183 = vmatprep.mubr.f32.mxu0 %v338_v45  ;;  %266 = vmatprep.mubr.f32.mxu1 %v338_v45  ;;  %s281_s23 = sshll.u32 %s339_s22, 4  ;;  %s282_s23 = int_to_ptr.vmem [resolvable:$true] %s281_s23 }
   0x6   :  { %v45_v14 = vunpack.c.0.s8 %v44_v11  ;;  %s312_s3 = scalar_lea.vmem %s282_s23, 512  ;;  %p317_p1 = scmp.lt.s32.totalorder %s282_s23, %s282_s23 }
   0x7   :  { %26 = vadd.xlane.f32.xlu0 %v25_v8  ;;  %p313_p0 = scmp.ne.s32.totalorder %s282_s23, %s312_s3  ;;  %p318_p2 = scmp.lt.s32.totalorder %s312_s3, %s312_s3 }
   0x8   :  { %v48_v17 = vsub.s32 %v45_v14, %v47_v15 }
   0x9   :  { %p319_p3 = por %p318_p2, %p317_p1 }
   0xb   :  { %37 = vadd.xlane.f32.xlu0 %v36_v9  ;;  %p320_p4 = pnand %p319_p3, %p313_p0 }
  0x94   :  { %v27_v13 = vpop.xlane.xlu0 %26 }
  0x98   :  { %v38_v16 = vpop.xlane.xlu0 %37 }
  0x99   :  { %v39_v18 = vadd.f32 %v38_v16, %v27_v13 }
  0x9b   :  { %v41_v19 = vmul.f32 0.001953125, %v39_v18 }
  0x9d   :  { %v49_v20 = vrot.slane %v41_v19, %v48_v17 }
  0x9f   :  { %v51_v21 = vsub.f32 %v18_v0, %v49_v20  ;;  %v62_v22 = vsub.f32 %v292_v1, %v49_v20 }
  0xa1   :  { %v52_v23 = vmul.f32 %v51_v21, %v51_v21  ;;  %v63_v24 = vmul.f32 %v62_v22, %v62_v22 }
  0xa3   :  { %v54_v25 = vcombine.high %v52_v23, %v52_v23  ;;  %v65_v26 = vcombine.high %v63_v24, %v63_v24  ;;  %v56_v27 = vsel %vm22_vm0, %v52_v23, 0.0  ;;  %v67_v31 = vsel %vm22_vm0, %v63_v24, 0.0 }
  0xa5   :  { %v57_v28 = vsel %vm22_vm0, %v54_v25, 0.0  ;;  %v68_v30 = vsel %vm22_vm0, %v65_v26, 0.0 }
  0xa6   :  { %v58_v29 = vadd.f32 %v57_v28, %v56_v27  ;;  %v69_v32 = vadd.f32 %v68_v30, %v67_v31 }
  0xa8   :  { %59 = vadd.xlane.f32.xlu1 %v58_v29 }
  0xac   :  { %70 = vadd.xlane.f32.xlu1 %v69_v32 }
 0x135   :  { %v60_v34 = vpop.xlane.xlu1 %59 }
 0x139   :  { %v71_v35 = vpop.xlane.xlu1 %70 }
 0x13a   :  { %v72_v36 = vadd.f32 %v71_v35, %v60_v34 }
 0x13c   :  { %v73_v37 = vmul.f32 0.001953125, %v72_v36 }
 0x13e   :  { %v75_v38 = vadd.f32 1e-05, %v73_v37 }
 0x140   :  { %310 = vrsqrt.f32 %v75_v38 }
 0x14a   :  { %v311_v40 = vpop.eup %310 }
 0x14b   :  { %v77_v41 = vmul.f32 %v311_v40, %v74_v39 }
 0x14d   :  { %84 = vperm.xlu0 %306, %v77_v41   ;;  %v79_v43 = vmul.f32 %v77_v41, %v41_v19 }
 0x14f   :  { %v80_v44 = vsub.f32 %v78_v42, %v79_v43 }
 0x151   :  { %97 = vperm.xlu1 %307, %v80_v44  }
 0x1cc   :  { %v85_v46 = vpop.permute.xlu0 %84 }
 0x1cd   :  { %v92_v47 = vrot.slane %v85_v46, %v48_v17 }
 0x1cf   :  { %v94_v49 = vmul.f32 %v92_v47, %v18_v0  ;;  %v193_v50 = vmul.f32 %v292_v1, %v92_v47 }
 0x1d0   :  { %v98_v48 = vpop.permute.xlu1 %97 }
 0x1d1   :  { %v105_v51 = vrot.slane %v98_v48, %v48_v17 }
 0x1d3   :  { %v107_v52 = vadd.f32 %v105_v51, %v94_v49  ;;  %v194_v53 = vadd.f32 %v193_v50, %v105_v51 }
 0x1d5   :  { %v108_v54 = vmax.f32 %v107_v52, 0.0  ;;  %v195_v55 = vmax.f32 %v194_v53, 0.0 }
 0x1d7   :  { %v110_v56 = vcombine.high %v108_v54, %v108_v54  ;;  %v197_v57 = vcombine.high %v195_v55, %v195_v55 }
 0x1d9   :  { %293 = vmatprep.subr.msk.mxu0 %vm22_vm0, %v110_v56  ;;  %297 = vmatprep.subr.msk.mxu1 %vm22_vm0, %v197_v57 }
 0x1da   :  { %294 = vmatpush1.msk.msra.mxu0 %vm22_vm0, %v108_v54  ;;  %298 = vmatpush1.msk.msra.mxu1 %vm22_vm0, %v195_v55 }
 0x1db   :  { %295 = vmatmul.mubr.msk.f32.vlgmr.msra.gmra.mrb[0].mxu0 %vm111_vm1, %v81_v58  ;;  %299 = vmatmul.mubr.msk.f32.vlgmr.msra.gmra.mrb[0].mxu1 %vm111_vm1, %v81_v58 }
 0x2ae   :  { %v185_v59 = vpop.f32.mrb[0].mxu0  ;;  %v268_v60 = vpop.f32.mrb[0].mxu1 }
 0x2af   :  { %190 = vst [vmem:[#allocation2] sm:$0xff] %v185_v59  ;;  %274 = vst [vmem:[#allocation2 + $0x10] sm:$0xff] %v268_v60  ;;  %v187_v61 = vpop.f32.mrb[1].mxu0  ;;  %v270_v62 = vpop.f32.mrb[1].mxu1 }
 0x2b0   :  { %191 = vst [vmem:[#allocation2 + $0x8] sm:$0xff] %v187_v61  ;;  %275 = vst [vmem:[#allocation2 + $0x18] sm:$0xff] %v270_v62 }
 0x2b1   :  { %323 = shalt.err (!%p320_p4)
}
 0x2b2   :  { %s324_s26 = scalar_lea.hbm %s410_s4, 512 }
 0x2b3   :  { %p325_p5 = scmp.ne.s32.totalorder %s410_s4, %s324_s26  ;;  %p328_p6 = scmp.lt.u32.totalorder %s324_s26, %s410_s4 }
 0x2b5   :  { %p330_p7 = pnand %p328_p6, %p325_p5 }
 0x2b7   :  { %333 = shalt.err (!%p330_p7)
}
 0x2b8   :  { %s340_s5 = smov 256   ;;  %s341_s6 = smov 16  }
 0x2b9   :  { %287 = dma.vmem_to_hbm [thread:$0]  %s282_s23, 512, %s410_s4, [#allocation3], %s340_s5, %s340_s5, %s341_s6  }
 0x2ba   :  { %334 = dma.done.wait [#allocation3], 512  }
 0x2bb   :  { %335 = vsyncadd [#allocation3], 4294966784 }
 0x2bc   :  { %291 = vsyncpa [#allocation3], 1 }

</bundles_post_ra>
